<compile_context>
chip_gen: v7x
topology: tpu7x:2x2x1
jax: 0.10.0
libtpu: 0.0.40
codegen_flags: <defaults>
</compile_context>

<pallas_src>
import functools
import math

import jax
import jax.numpy as jnp
from jax.experimental import pallas as pl
from jax.experimental.pallas import tpu as pltpu


def _round_up(a, b):
    return (a + b - 1) // b * b


def _cdiv(a, b):
    return (a + b - 1) // b


# ---------------------------------------------------------------------------
# Kernels
# ---------------------------------------------------------------------------
def _write_heads(z, out_ref, nt):
    # Fused lane layout:  [ mu1 | mu2 | pad ] [ log_std1 | log_std2 | pad ]
    #                       <----- nt ----->   <-------- Np - nt -------->
    # Both slabs are 128-aligned -> two static unmasked lane-dense stores;
    # tanh / softplus each touch only their own lanes.
    out_ref[:, :nt] = jnp.tanh(z[:, :nt]).astype(out_ref.dtype)
    out_ref[:, nt:] = jax.nn.softplus(z[:, nt:]).astype(out_ref.dtype)


def ffn_kernel_resident(x_ref, w1_ref, b1_ref, wh_ref, bh_ref, out_ref, *, nt):
    # hidden = relu(x @ W1 + b1); dropout(p=0.1) is identity at inference.
    h = jnp.dot(x_ref[...], w1_ref[...], preferred_element_type=jnp.float32)
    h = jnp.maximum(h + b1_ref[...], 0.0)
    # Single fused head matmul (all 4 projections at once).
    z = jnp.dot(h.astype(wh_ref.dtype), wh_ref[...],
                preferred_element_type=jnp.float32) + bh_ref[...]
    _write_heads(z, out_ref, nt)


def ffn_kernel_ktiled(x_ref, w1_ref, b1_ref, wh_ref, bh_ref, out_ref, acc_ref, *, nt):
    # W1 is streamed along K (d_model); f32 accumulator lives in VMEM scratch.
    k = pl.program_id(1)

    @pl.when(k == 0)
    def _():
        acc_ref[...] = jnp.zeros_like(acc_ref)

    acc_ref[...] += jnp.dot(x_ref[...], w1_ref[...],
                            preferred_element_type=jnp.float32)

    @pl.when(k == pl.num_programs(1) - 1)
    def _():
        h = jnp.maximum(acc_ref[...] + b1_ref[...], 0.0)
        z = jnp.dot(h.astype(wh_ref.dtype), wh_ref[...],
                    preferred_element_type=jnp.float32) + bh_ref[...]
        _write_heads(z, out_ref, nt)


# ---------------------------------------------------------------------------
# Parameter prep (one-time, hoisted out of the forward pass)
# ---------------------------------------------------------------------------
def init_params(key, d_model, latent_dim):
    """nn.Linear-style init: U(-1/sqrt(fan_in), 1/sqrt(fan_in)); weights (in, out)."""
    keys = jax.random.split(key, 10)

    def linear(kw, kb, fan_in, fan_out):
        bound = 1.0 / math.sqrt(fan_in)
        w = jax.random.uniform(kw, (fan_in, fan_out), jnp.float32, -bound, bound)
        b = jax.random.uniform(kb, (1, fan_out), jnp.float32, -bound, bound)
        return w, b

    w1, b1 = linear(keys[0], keys[1], d_model, d_model)
    wm1, bm1 = linear(keys[2], keys[3], d_model, latent_dim)
    wls1, bls1 = linear(keys[4], keys[5], d_model, latent_dim)
    wm2, bm2 = linear(keys[6], keys[7], d_model, latent_dim)
    wls2, bls2 = linear(keys[8], keys[9], d_model, latent_dim)
    return dict(w1=w1, b1=b1, wm1=wm1, bm1=bm1, wls1=wls1, bls1=bls1,
                wm2=wm2, bm2=bm2, wls2=wls2, bls2=bls2)


def prepare_params(params, *, compute_dtype=jnp.bfloat16):
    """One-time packing: lane-pad W1/b1, fuse + lane-pad the 4 head projections.

    Padded lane columns are numerically exact: relu(0 + 0) = 0 hidden columns and
    zero rows in the fused head weight; pad output lanes are sliced away.
    """
    f32 = jnp.float32
    cd = compute_dtype
    D = params["w1"].shape[0]
    L = params["wm1"].shape[1]
    Dp = _round_up(D, 128)
    nt = _round_up(2 * L, 128)       # tanh slab:    [mu1 | mu2 | pad]
    Np = 2 * nt                      # + softplus slab: [ls1 | ls2 | pad]

    w1 = jnp.zeros((Dp, Dp), cd).at[:D, :D].set(params["w1"].astype(cd))
    b1 = jnp.zeros((1, Dp), f32).at[:, :D].set(params["b1"].astype(f32))

    wh = jnp.zeros((Dp, Np), cd)
    wh = wh.at[:D, 0:L].set(params["wm1"].astype(cd))
    wh = wh.at[:D, L:2 * L].set(params["wm2"].astype(cd))
    wh = wh.at[:D, nt:nt + L].set(params["wls1"].astype(cd))
    wh = wh.at[:D, nt + L:nt + 2 * L].set(params["wls2"].astype(cd))

    bh = jnp.zeros((1, Np), f32)
    bh = bh.at[:, 0:L].set(params["bm1"].astype(f32))
    bh = bh.at[:, L:2 * L].set(params["bm2"].astype(f32))
    bh = bh.at[:, nt:nt + L].set(params["bls1"].astype(f32))
    bh = bh.at[:, nt + L:nt + 2 * L].set(params["bls2"].astype(f32))

    return dict(w1=w1, b1=b1, wh=wh, bh=bh,
                d_model=D, latent_dim=L, Dp=Dp, Np=Np, nt=nt,
                compute_dtype=cd)


# ---------------------------------------------------------------------------
# Wrapper
# ---------------------------------------------------------------------------
def _vmem_capacity_bytes():
    try:
        return int(pltpu.get_tpu_info().vmem_capacity_bytes)
    except Exception:
        return 64 * 1024 * 1024          # conservative: v7x per-TC VMEM


def _resident_spec(shape, index_map):
    """BlockSpec for grid-invariant operands: single-buffered (no dead 2nd copy)."""
    buffered = getattr(pl, "Buffered", None)
    if buffered is not None:
        try:
            return pl.BlockSpec(shape, index_map, pipeline_mode=buffered(1))
        except TypeError:                # older BlockSpec without pipeline_mode
            pass
    return pl.BlockSpec(shape, index_map)


def feed_forward(x, prepped, *, tm=None, tk=None):
    """x: (..., d_model). Returns (mu1, log_std1, mu2, log_std2), each (..., latent_dim)."""
    f32 = jnp.float32
    cd = prepped["compute_dtype"]
    D, L = prepped["d_model"], prepped["latent_dim"]
    Dp, Np, nt = prepped["Dp"], prepped["Np"], prepped["nt"]
    assert x.shape[-1] == D, "last dim of x must be d_model"
    lead = x.shape[:-1]
    M = 1
    for s in lead:
        M *= s

    itemsize = jnp.dtype(cd).itemsize
    vmem_cap = _vmem_capacity_bytes()
    budget = int(vmem_cap * 0.85)                 # headroom for compiler scratch/sems
    big_vmem = vmem_cap > 96 * 1024 * 1024        # v5e/v6e (128 MiB) vs v7x (64 MiB)

    # ---- M tiling: 16-row alignment (bf16 packs 16 sublanes/vreg).
    if tm is None:
        tm = 512 if big_vmem else 256             # bigger tiles amortize step overhead
    tm_eff = min(_round_up(tm, 16), _round_up(M, 16))
    # v7x has 2 TensorCores: don't leave one idle on a single-tile parallel grid.
    if (not big_vmem) and _cdiv(M, tm_eff) == 1 and M >= 256:
        tm_eff = _round_up(_cdiv(M, 2), 16)
    Mp = _round_up(M, tm_eff)
    n_row_tiles = Mp // tm_eff

    # ---- VMEM footprint (weights single-buffered, x/out double-buffered,
    #      h intermediate + ~3 live (tm, Np) f32 activation temporaries).
    def _est(ktiled, tk_):
        act_tmp = 3 * tm_eff * Np * 4
        h_bytes = tm_eff * Dp * 4 + (tm_eff * Dp * itemsize if cd != f32 else 0)
        out_tiles = 2 * tm_eff * Np * 4
        bias = (Dp + Np) * 4
        if not ktiled:
            w = (Dp * Dp + Dp * Np) * itemsize
            x_tiles = 2 * tm_eff * Dp * itemsize
            return w + bias + x_tiles + out_tiles + h_bytes + act_tmp
        w = 2 * tk_ * Dp * itemsize + Dp * Np * itemsize
        x_tiles = 2 * tm_eff * tk_ * itemsize
        acc = tm_eff * Dp * 4
        return w + bias + x_tiles + out_tiles + h_bytes + acc + act_tmp

    def _with_headroom(b):
        return int(b * 1.3) + (2 << 20)

    use_ktiled = tk is not None and tk < Dp
    if not use_ktiled and _with_headroom(_est(False, 0)) > budget:
        use_ktiled = True                          # resident W1 no longer fits -> stream K
    if use_ktiled:
        if tk is None:
            tk = 128
            for cand in (2048, 1024, 512, 256, 128):
                if Dp % cand == 0 and _with_headroom(_est(True, cand)) <= budget:
                    tk = cand
                    break
        tk = min(_round_up(tk, 128), Dp)
        assert Dp % tk == 0, "tk must divide the padded d_model"
        est = _est(True, tk)
    else:
        est = _est(False, 0)

    vmem_limit = None
    if _with_headroom(est) > 12 * 1024 * 1024:     # above v5e's 16 MiB default scope
        vmem_limit = min(_with_headroom(est), budget)

    # ---- x: skip the full pad copy when already lane/row aligned.
    xf = x.reshape(M, D).astype(cd)
    x2 = xf if (D == Dp and M == Mp) else jnp.pad(xf, ((0, Mp - M), (0, Dp - D)))

    out_shape = jax.ShapeDtypeStruct((Mp, Np), f32)

    if not use_ktiled:
        grid = (n_row_tiles,)
        in_specs = [
            pl.BlockSpec((tm_eff, Dp), lambda i: (i, 0)),      # x row tile (streamed)
            _resident_spec((Dp, Dp), lambda i: (0, 0)),        # W1 (resident, 1 buffer)
            _resident_spec((1, Dp), lambda i: (0, 0)),         # b1
            _resident_spec((Dp, Np), lambda i: (0, 0)),        # fused head weights
            _resident_spec((1, Np), lambda i: (0, 0)),         # fused head bias
        ]
        out_specs = pl.BlockSpec((tm_eff, Np), lambda i: (i, 0))
        kernel = functools.partial(ffn_kernel_resident, nt=nt)
        scratch = []
        dims = ("parallel",)
    else:
        grid = (n_row_tiles, Dp // tk)
        in_specs = [
            pl.BlockSpec((tm_eff, tk), lambda i, k: (i, k)),   # x (row, K) tile
            pl.BlockSpec((tk, Dp), lambda i, k: (k, 0)),       # W1 K-streamed
            _resident_spec((1, Dp), lambda i, k: (0, 0)),      # b1
            _resident_spec((Dp, Np), lambda i, k: (0, 0)),     # fused head weights
            _resident_spec((1, Np), lambda i, k: (0, 0)),      # fused head bias
        ]
        out_specs = pl.BlockSpec((tm_eff, Np), lambda i, k: (i, 0))
        kernel = functools.partial(ffn_kernel_ktiled, nt=nt)
        scratch = [pltpu.VMEM((tm_eff, Dp), jnp.float32)]
        dims = ("parallel", "arbitrary")

    out = pl.pallas_call(
        kernel,
        out_shape=out_shape,
        grid_spec=pltpu.PrefetchScalarGridSpec(
            num_scalar_prefetch=0,
            grid=grid,
            in_specs=in_specs,
            out_specs=out_specs,
            scratch_shapes=scratch,
        ),
        compiler_params=pltpu.CompilerParams(
            dimension_semantics=dims,
            vmem_limit_bytes=vmem_limit,
        ),
    )(x2, prepped["w1"], prepped["b1"], prepped["wh"], prepped["bh"])

    out = out[:M]
    mu1 = out[:, 0:L].reshape(*lead, L)
    mu2 = out[:, L:2 * L].reshape(*lead, L)
    ls1 = out[:, nt:nt + L].reshape(*lead, L)
    ls2 = out[:, nt + L:nt + 2 * L].reshape(*lead, L)
    return mu1, ls1, mu2, ls2


# ---------------------------------------------------------------------------
# Reference + self-test
# ---------------------------------------------------------------------------
def _reference(x, p):
    """Pure-JAX reference (highest matmul precision -> near-exact gold values)."""
    hp = jax.lax.Precision.HIGHEST
    h = jax.nn.relu(jnp.dot(x, p["w1"], precision=hp) + p["b1"])
    return (jnp.tanh(jnp.dot(h, p["wm1"], precision=hp) + p["bm1"]),
            jax.nn.softplus(jnp.dot(h, p["wls1"], precision=hp) + p["bls1"]),
            jnp.tanh(jnp.dot(h, p["wm2"], precision=hp) + p["bm2"]),
            jax.nn.softplus(jnp.dot(h, p["wls2"], precision=hp) + p["bls2"]))


def _check(outs, refs, shape, tol):
    for o, r in zip(outs, refs):
        assert o.shape == shape, (o.shape, shape)
        err = float(jnp.max(jnp.abs(o.astype(jnp.float32) - r)))
        assert err < tol, f"max abs err {err} >= {tol}"


if __name__ == "__main__":
    key = jax.random.PRNGKey(0)
    kx, kp, kx2, kp2 = jax.random.split(key, 4)

    # --- Small demo shapes (resident-weight path) ---------------------------
    B, S, D, L = 2, 8, 32, 16
    x = jax.random.normal(kx, (B, S, D), jnp.float32)
    params = init_params(kp, D, L)
    refs = _reference(x, params)

    # f32 compute path (tolerance allows for MXU f32 pass-decomposition differences).
    pp_f32 = prepare_params(params, compute_dtype=jnp.float32)
    outs = jax.block_until_ready(feed_forward(x, pp_f32))
    _check(outs, refs, (B, S, L), 1e-2)

    # bf16 compute path (default): f32 accumulation, relaxed tolerance.
    pp_bf16 = prepare_params(params)
    outs = jax.block_until_ready(feed_forward(x, pp_bf16))
    _check(outs, refs, (B, S, L), 5e-2)

    # --- K-streamed W1 path (forced with tk=128), ragged M, larger d_model ---
    B2, S2, D2, L2 = 3, 5, 256, 16
    x2 = jax.random.normal(kx2, (B2, S2, D2), jnp.float32)
    params2 = init_params(kp2, D2, L2)
    refs2 = _reference(x2, params2)
    pp2 = prepare_params(params2, compute_dtype=jnp.float32)
    outs2 = jax.block_until_ready(feed_forward(x2, pp2, tk=128))
    _check(outs2, refs2, (B2, S2, L2), 1e-2)

    # TODO(synk): nn.Dropout(0.1) is a no-op at inference; training-mode dropout
    # masks are not generated inside the kernel.
    print("KERNEL_OK")
</pallas_src>

<mosaic_0001>
module attributes {stable_mosaic.version = 11 : i64} {
  func.func @ffn_kernel_resident(%arg0: i32, %arg1: memref<16x128xf32, #tpu.memory_space<vmem>>, %arg2: memref<128x128xf32, #tpu.memory_space<vmem>>, %arg3: memref<1x128xf32, #tpu.memory_space<vmem>>, %arg4: memref<128x256xf32, #tpu.memory_space<vmem>>, %arg5: memref<1x256xf32, #tpu.memory_space<vmem>>, %arg6: memref<16x256xf32, #tpu.memory_space<vmem>>) attributes {dimension_semantics = [#tpu.dimension_semantics<parallel>], iteration_bounds = array<i64: 1>, scalar_prefetch = 0 : i64, scratch_operands = 0 : i64, tpu.core_type = #tpu.core_type<tc>, window_params = [{transform_indices = @transform_0, window_bounds = array<i64: 16, 128>}, {pipeline_mode = #tpu.pipeline_mode<synchronous>, transform_indices = @transform_1, window_bounds = array<i64: 128, 128>}, {pipeline_mode = #tpu.pipeline_mode<synchronous>, transform_indices = @transform_2, window_bounds = array<i64: 1, 128>}, {pipeline_mode = #tpu.pipeline_mode<synchronous>, transform_indices = @transform_3, window_bounds = array<i64: 128, 256>}, {pipeline_mode = #tpu.pipeline_mode<synchronous>, transform_indices = @transform_4, window_bounds = array<i64: 1, 256>}, {transform_indices = @transform_5, window_bounds = array<i64: 16, 256>}]} {
    %c0 = arith.constant 0 : index
    %c0_0 = arith.constant 0 : index
    %0 = vector.load %arg1[%c0, %c0_0] : memref<16x128xf32, #tpu.memory_space<vmem>>, vector<16x128xf32>
    %c0_1 = arith.constant 0 : index
    %c0_2 = arith.constant 0 : index
    %1 = vector.load %arg2[%c0_1, %c0_2] : memref<128x128xf32, #tpu.memory_space<vmem>>, vector<128x128xf32>
    %cst = arith.constant dense<0.000000e+00> : vector<16x128xf32>
    %2 = tpu.matmul %0, %1, %cst {dimension_numbers = #tpu.dot_dimension_numbers<[1], [0], [0], [1], [0, 0, 1, 1], [], []>} : vector<16x128xf32>, vector<128x128xf32>, vector<16x128xf32> -> vector<16x128xf32>
    %c0_3 = arith.constant 0 : index
    %c0_4 = arith.constant 0 : index
    %3 = vector.load %arg3[%c0_3, %c0_4] : memref<1x128xf32, #tpu.memory_space<vmem>>, vector<1x128xf32>
    %4 = vector.broadcast %3 : vector<1x128xf32> to vector<16x128xf32>
    %5 = arith.addf %2, %4 : vector<16x128xf32>
    %cst_5 = arith.constant 0.000000e+00 : f32
    %6 = vector.broadcast %cst_5 : f32 to vector<16x128xf32>
    %7 = arith.maximumf %5, %6 : vector<16x128xf32>
    %c0_6 = arith.constant 0 : index
    %c0_7 = arith.constant 0 : index
    %8 = vector.load %arg4[%c0_6, %c0_7] : memref<128x256xf32, #tpu.memory_space<vmem>>, vector<128x256xf32>
    %cst_8 = arith.constant dense<0.000000e+00> : vector<16x256xf32>
    %9 = tpu.matmul %7, %8, %cst_8 {dimension_numbers = #tpu.dot_dimension_numbers<[1], [0], [0], [1], [0, 0, 1, 1], [], []>} : vector<16x128xf32>, vector<128x256xf32>, vector<16x256xf32> -> vector<16x256xf32>
    %c0_9 = arith.constant 0 : index
    %c0_10 = arith.constant 0 : index
    %10 = vector.load %arg5[%c0_9, %c0_10] : memref<1x256xf32, #tpu.memory_space<vmem>>, vector<1x256xf32>
    %11 = vector.broadcast %10 : vector<1x256xf32> to vector<16x256xf32>
    %12 = arith.addf %9, %11 : vector<16x256xf32>
    %13 = vector.extract_strided_slice %12 {offsets = [0, 0], sizes = [16, 128], strides = [1, 1]} : vector<16x256xf32> to vector<16x128xf32>
    %14 = math.tanh %13 : vector<16x128xf32>
    %c0_11 = arith.constant 0 : index
    %c0_12 = arith.constant 0 : index
    %15 = vector.load %arg6[%c0_11, %c0_12] : memref<16x256xf32, #tpu.memory_space<vmem>>, vector<16x128xf32>
    tpu.vector_store %arg6[%c0_11, %c0_12], %14 {strides = array<i32>} : memref<16x256xf32, #tpu.memory_space<vmem>>, vector<16x128xf32>,
    %16 = vector.extract_strided_slice %12 {offsets = [0, 128], sizes = [16, 128], strides = [1, 1]} : vector<16x256xf32> to vector<16x128xf32>
    %cst_13 = arith.constant 0.000000e+00 : f32
    %17 = vector.broadcast %cst_13 : f32 to vector<16x128xf32>
    %18 = arith.maximumf %16, %17 : vector<16x128xf32>
    %19 = vector.broadcast %cst_13 : f32 to vector<16x128xf32>
    %20 = arith.subf %16, %19 : vector<16x128xf32>
    %21 = arith.cmpf one, %20, %20 : vector<16x128xf32>
    %22 = vector.broadcast %cst_13 : f32 to vector<16x128xf32>
    %23 = arith.addf %16, %22 : vector<16x128xf32>
    %24 = math.absf %20 : vector<16x128xf32>
    %cst_14 = arith.constant 0.000000e+00 : f32
    %25 = vector.broadcast %cst_14 : f32 to vector<16x128xf32>
    %26 = arith.subf %25, %24 : vector<16x128xf32>
    %27 = math.exp %26 : vector<16x128xf32>
    %28 = math.log1p %27 : vector<16x128xf32>
    %29 = arith.addf %18, %28 : vector<16x128xf32>
    %30 = arith.select %21, %23, %29 : vector<16x128xi1>, vector<16x128xf32>
    %c0_15 = arith.constant 0 : index
    %c128 = arith.constant 128 : index
    %31 = vector.load %arg6[%c0_15, %c128] : memref<16x256xf32, #tpu.memory_space<vmem>>, vector<16x128xf32>
    tpu.vector_store %arg6[%c0_15, %c128], %30 {strides = array<i32>} : memref<16x256xf32, #tpu.memory_space<vmem>>, vector<16x128xf32>,
    return
  }
  func.func @transform_0(%arg0: i32) -> (i32, i32) {
    %c0_i32 = arith.constant 0 : i32
    %c0_i32_0 = arith.constant 0 : i32
    return %arg0, %c0_i32 : i32, i32
  }
  func.func @transform_1(%arg0: i32) -> (i32, i32) {
    %c0_i32 = arith.constant 0 : i32
    %c0_i32_0 = arith.constant 0 : i32
    %c0_i32_1 = arith.constant 0 : i32
    return %c0_i32, %c0_i32_0 : i32, i32
  }
  func.func @transform_2(%arg0: i32) -> (i32, i32) {
    %c0_i32 = arith.constant 0 : i32
    %c0_i32_0 = arith.constant 0 : i32
    %c0_i32_1 = arith.constant 0 : i32
    return %c0_i32, %c0_i32_0 : i32, i32
  }
  func.func @transform_3(%arg0: i32) -> (i32, i32) {
    %c0_i32 = arith.constant 0 : i32
    %c0_i32_0 = arith.constant 0 : i32
    %c0_i32_1 = arith.constant 0 : i32
    return %c0_i32, %c0_i32_0 : i32, i32
  }
  func.func @transform_4(%arg0: i32) -> (i32, i32) {
    %c0_i32 = arith.constant 0 : i32
    %c0_i32_0 = arith.constant 0 : i32
    %c0_i32_1 = arith.constant 0 : i32
    return %c0_i32, %c0_i32_0 : i32, i32
  }
  func.func @transform_5(%arg0: i32) -> (i32, i32) {
    %c0_i32 = arith.constant 0 : i32
    %c0_i32_0 = arith.constant 0 : i32
    return %arg0, %c0_i32 : i32, i32
  }
}

</mosaic_0001>

<bundles_post_ra>
// kernel: tpu_custom_call.1
= control target key start
LH: loop header
LB: loop body
LE: loop exit
PB: predicated region body
PF: predicated region fallthrough
CT: control target
= control target key end

     0   :  { %10 = vsyncpa [#allocation3], 0  ;;  %s684_s0 = inlined_call_operand.hbm [shape: f32[16,128], index: 0, kind: input, shape index: {}]   ;;  %s685_s1 = inlined_call_operand.hbm [shape: f32[128,128], index: 1, kind: input, shape index: {}]   ;;  %s686_s2 = inlined_call_operand.vmem [shape: f32[1,128], index: 2, kind: input, shape index: {}]   ;;  %s687_s3 = inlined_call_operand.hbm [shape: f32[128,256], index: 3, kind: input, shape index: {}]   ;;  %s688_s4 = inlined_call_operand.vmem [shape: f32[1,256], index: 4, kind: input, shape index: {}]   ;;  %s689_s5 = inlined_call_operand.hbm [shape: f32[16,256], index: 5, kind: output, shape index: {}]  }
   0x1   :  { %11 = vsyncpa [#allocation6], 0 }
   0x2   :  { %12 = vsyncpa [#allocation4], 0  ;;  %s578_s18 = smov [#allocation5]   ;;  %s579_s20 = smov [#allocation2]  }
   0x3   :  { %s30_s19 = sshll.u32 %s578_s18, 4  ;;  %s18_s21 = sshll.u32 %s579_s20, 4  ;;  %s31_s19 = int_to_ptr.vmem [resolvable:$true] %s30_s19  ;;  %s617_s21 = int_to_ptr.vmem [resolvable:$true] %s18_s21 }
   0x4   :  { %s484_s24 = scalar_lea.hbm %s685_s1, 2048 }
   0x5   :  { %p485_p0 = scmp.ne.s32.totalorder %s685_s1, %s484_s24  ;;  %p488_p1 = scmp.lt.u32.totalorder %s484_s24, %s685_s1 }
   0x7   :  { %p490_p2 = pnand %p488_p1, %p485_p0 }
   0x9   :  { %493 = shalt.err (!%p490_p2)
}
   0xa   :  { %s494_s29 = scalar_lea.vmem %s31_s19, 2048  ;;  %p499_p4 = scmp.lt.s32.totalorder %s31_s19, %s31_s19 }
   0xb   :  { %p495_p3 = scmp.ne.s32.totalorder %s31_s19, %s494_s29  ;;  %p500_p5 = scmp.lt.s32.totalorder %s494_s29, %s494_s29 }
   0xd   :  { %p501_p6 = por %p500_p5, %p499_p4 }
   0xf   :  { %p502_p7 = pnand %p501_p6, %p495_p3 }
  0x11   :  { %505 = shalt.err (!%p502_p7)
}
  0x12   :  { %s580_s30 = smov 128   ;;  %s581_s6 = smov 8  }
  0x13   :  { %36 = dma.hbm_to_vmem [thread:$0]  %s685_s1, 2048, %s31_s19, [#allocation6], %s580_s30, %s580_s30, %s581_s6  }
  0x14   :  { %s506_s11 = scalar_lea.hbm %s684_s0, 256 }
  0x15   :  { %p507_p8 = scmp.ne.s32.totalorder %s684_s0, %s506_s11  ;;  %p510_p9 = scmp.lt.u32.totalorder %s506_s11, %s684_s0 }
  0x17   :  { %p512_p10 = pnand %p510_p9, %p507_p8 }
  0x19   :  { %515 = shalt.err (!%p512_p10)
}
  0x1a   :  { %s516_s16 = scalar_lea.vmem %s617_s21, 256  ;;  %p521_p12 = scmp.lt.s32.totalorder %s617_s21, %s617_s21 }
  0x1b   :  { %p517_p11 = scmp.ne.s32.totalorder %s617_s21, %s516_s16  ;;  %p522_p13 = scmp.lt.s32.totalorder %s516_s16, %s516_s16 }
  0x1d   :  { %p523_p0 = por %p522_p13, %p521_p12 }
  0x1f   :  { %p524_p1 = pnand %p523_p0, %p517_p11 }
  0x21   :  { %527 = shalt.err (!%p524_p1)
}
  0x22   :  { %24 = dma.hbm_to_vmem [thread:$0]  %s684_s0, 256, %s617_s21, [#allocation3], %s580_s30, %s580_s30, %s581_s6  }
  0x23   :  { %s582_s18 = smov [#allocation7]   ;;  %s528_s23 = scalar_lea.hbm %s687_s3, 4096 }
  0x24   :  { %s44_s19 = sshll.u32 %s582_s18, 4  ;;  %p529_p2 = scmp.ne.s32.totalorder %s687_s3, %s528_s23  ;;  %s45_s19 = int_to_ptr.vmem [resolvable:$true] %s44_s19 }
  0x25   :  { %p532_p3 = scmp.lt.u32.totalorder %s528_s23, %s687_s3 }
  0x27   :  { %p534_p4 = pnand %p532_p3, %p529_p2 }
  0x29   :  { %537 = shalt.err (!%p534_p4)
}
  0x2a   :  { %s538_s28 = scalar_lea.vmem %s45_s19, 4096  ;;  %p543_p6 = scmp.lt.s32.totalorder %s45_s19, %s45_s19 }
  0x2b   :  { %p539_p5 = scmp.ne.s32.totalorder %s45_s19, %s538_s28  ;;  %p544_p7 = scmp.lt.s32.totalorder %s538_s28, %s538_s28 }
  0x2d   :  { %p545_p8 = por %p544_p7, %p543_p6 }
  0x2f   :  { %p546_p9 = pnand %p545_p8, %p539_p5 }
  0x31   :  { %549 = shalt.err (!%p546_p9)
}
  0x32   :  { %s583_s0 = smov 256   ;;  %s584_s21 = smov 16  }
  0x33   :  { %50 = dma.hbm_to_vmem [thread:$0]  %s687_s3, 4096, %s45_s19, [#allocation6], %s583_s0, %s583_s0, %s584_s21  }
  0x34   :  { %572 = dma.done.wait [#allocation3], 256  }
  0x35   :  { %573 = vsyncadd [#allocation3], 4294967040 }
  0x36   :  { %574 = dma.done.wait [#allocation6], 6144  }
  0x37   :  { %575 = vsyncadd [#allocation6], 4294961152  ;;  %v64_v0 = vld [vmem:[#allocation5] sm:$0xff]  ;;  %v65_v1 = vld [vmem:[#allocation5 + $0x8] sm:$0xff] }
  0x38   :  { %v66_v2 = vld [vmem:[#allocation5 + $0x10] sm:$0xff]  ;;  %v399_v3 = vpack.c.bf16 %v65_v1, %v64_v0  ;;  %v67_v4 = vld [vmem:[#allocation5 + $0x18] sm:$0xff]  ;;  %v68_v6 = vld [vmem:[#allocation5 + $0x20] sm:$0xff] }
  0x39   :  { %v403_v5 = vpack.c.bf16 %v67_v4, %v66_v2  ;;  %v69_v7 = vld [vmem:[#allocation5 + $0x28] sm:$0xff]  ;;  %v70_v9 = vld [vmem:[#allocation5 + $0x30] sm:$0xff]  ;;  %v71_v10 = vld [vmem:[#allocation5 + $0x38] sm:$0xff] }
  0x3a   :  { %400 = vmatprep.subr.bf16.mxu0 %v399_v3  ;;  %v407_v8 = vpack.c.bf16 %v69_v7, %v68_v6  ;;  %v62_v11 = vld [vmem:[#allocation2] sm:$0xff]  ;;  %v165_v12 = vld [vmem:[#allocation7 + $0x8] sm:$0xff]  ;;  %v167_v13 = vld [vmem:[#allocation7 + $0x18] sm:$0xff]  ;;  %v411_v24 = vpack.c.bf16 %v71_v10, %v70_v9  ;;  %v585_v10 = vmov 0.0  }
  0x3b   :  { %402 = vmatpush3.bf16.msra.mxu0 %v399_v3  ;;  %396 = vmatprep.mubr.f32.mxu0 %v62_v11  ;;  %v164_v14 = vld [vmem:[#allocation7] sm:$0xff]  ;;  %v431_v15 = vpack.c.bf16 %v167_v13, %v165_v12  ;;  %v166_v16 = vld [vmem:[#allocation7 + $0x10] sm:$0xff]  ;;  %v169_v17 = vld [vmem:[#allocation7 + $0x28] sm:$0xff] }
  0x3c   :  { %404 = vmatprep.subr.bf16.mxu0 %v403_v5  ;;  %v171_v18 = vld [vmem:[#allocation7 + $0x38] sm:$0xff]  ;;  %v433_v19 = vpack.c.bf16 %v166_v16, %v164_v14  ;;  %v168_v21 = vld [vmem:[#allocation7 + $0x20] sm:$0xff]  ;;  %v170_v22 = vld [vmem:[#allocation7 + $0x30] sm:$0xff]  ;;  %272 = vmatprep.mubr.f32.mxu1 %v585_v10 }
  0x3d   :  { %v435_v20 = vpack.c.bf16 %v171_v18, %v169_v17  ;;  %v173_v23 = vld [vmem:[#allocation7 + $0x48] sm:$0xff]  ;;  %432 = vmatprep.subr.bf16.mxu1 %v431_v15  ;;  %v175_v25 = vld [vmem:[#allocation7 + $0x58] sm:$0xff]  ;;  %v72_v26 = vld [vmem:[#allocation5 + $0x40] sm:$0xff]  ;;  %v437_v28 = vpack.c.bf16 %v170_v22, %v168_v21  ;;  %v198_v18 = vlaneseq }
  0x3e   :  { %v73_v27 = vld [vmem:[#allocation5 + $0x48] sm:$0xff]  ;;  %434 = vmatpush1.bf16.msra.mxu1 %v433_v19  ;;  %v439_v29 = vpack.c.bf16 %v175_v25, %v173_v23  ;;  %v172_v30 = vld [vmem:[#allocation7 + $0x40] sm:$0xff]  ;;  %v174_v31 = vld [vmem:[#allocation7 + $0x50] sm:$0xff] }
  0x3f   :  { %406 = vmatpush3.bf16.msra.mxu0 %v403_v5  ;;  %436 = vmatprep.subr.bf16.mxu1 %v435_v20  ;;  %v177_v32 = vld [vmem:[#allocation7 + $0x68] sm:$0xff]  ;;  %v179_v33 = vld [vmem:[#allocation7 + $0x78] sm:$0xff]  ;;  %v415_v34 = vpack.c.bf16 %v73_v27, %v72_v26  ;;  %v74_v35 = vld [vmem:[#allocation5 + $0x50] sm:$0xff]  ;;  %v441_v37 = vpack.c.bf16 %v174_v31, %v172_v30  ;;  %v199_v19 = vshrl.u32 %v198_v18, 7 }
  0x40   :  { %408 = vmatprep.subr.bf16.mxu0 %v407_v8  ;;  %v75_v36 = vld [vmem:[#allocation5 + $0x58] sm:$0xff]  ;;  %v443_v38 = vpack.c.bf16 %v179_v33, %v177_v32  ;;  %v176_v39 = vld [vmem:[#allocation7 + $0x60] sm:$0xff]  ;;  %v178_v40 = vld [vmem:[#allocation7 + $0x70] sm:$0xff] }
  0x41   :  { %v181_v41 = vld [vmem:[#allocation7 + $0x88] sm:$0xff]  ;;  %v183_v42 = vld [vmem:[#allocation7 + $0x98] sm:$0xff]  ;;  %v419_v43 = vpack.c.bf16 %v75_v36, %v74_v35  ;;  %v76_v44 = vld [vmem:[#allocation5 + $0x60] sm:$0xff]  ;;  %v445_v46 = vpack.c.bf16 %v178_v40, %v176_v39  ;;  %v200_v20 = vsub.s32 0, %v199_v19  ;;  %v204_v22 = vsub.s32 1, %v199_v19 }
  0x42   :  { %438 = vmatpush1.bf16.msra.mxu1 %v437_v28  ;;  %v77_v45 = vld [vmem:[#allocation5 + $0x68] sm:$0xff]  ;;  %v447_v47 = vpack.c.bf16 %v183_v42, %v181_v41  ;;  %v180_v48 = vld [vmem:[#allocation7 + $0x80] sm:$0xff]  ;;  %v182_v49 = vld [vmem:[#allocation7 + $0x90] sm:$0xff] }
  0x43   :  { %410 = vmatpush3.bf16.msra.mxu0 %v407_v8  ;;  %440 = vmatprep.subr.bf16.mxu1 %v439_v29  ;;  %v185_v50 = vld [vmem:[#allocation7 + $0xa8] sm:$0xff]  ;;  %v187_v51 = vld [vmem:[#allocation7 + $0xb8] sm:$0xff]  ;;  %v423_v52 = vpack.c.bf16 %v77_v45, %v76_v44  ;;  %v78_v53 = vld [vmem:[#allocation5 + $0x70] sm:$0xff]  ;;  %v449_v55 = vpack.c.bf16 %v182_v49, %v180_v48 }
  0x44   :  { %412 = vmatprep.subr.bf16.mxu0 %v411_v24  ;;  %v79_v54 = vld [vmem:[#allocation5 + $0x78] sm:$0xff]  ;;  %v451_v56 = vpack.c.bf16 %v187_v51, %v185_v50  ;;  %v184_v57 = vld [vmem:[#allocation7 + $0xa0] sm:$0xff]  ;;  %v186_v58 = vld [vmem:[#allocation7 + $0xb0] sm:$0xff] }
  0x45   :  { %v189_v59 = vld [vmem:[#allocation7 + $0xc8] sm:$0xff]  ;;  %v191_v60 = vld [vmem:[#allocation7 + $0xd8] sm:$0xff]  ;;  %v427_v61 = vpack.c.bf16 %v79_v54, %v78_v53  ;;  %v453_v62 = vpack.c.bf16 %v186_v58, %v184_v57  ;;  %v188_v0 = vld [vmem:[#allocation7 + $0xc0] sm:$0xff] }
  0x46   :  { %442 = vmatpush1.bf16.msra.mxu1 %v441_v37  ;;  %v455_v63 = vpack.c.bf16 %v191_v60, %v189_v59  ;;  %v190_v1 = vld [vmem:[#allocation7 + $0xd0] sm:$0xff]  ;;  %v63_v3 = vld [vmem:[#allocation2 + $0x8] sm:$0xff]  ;;  %v193_v4 = vld [vmem:[#allocation7 + $0xe8] sm:$0xff] }
  0x47   :  { %414 = vmatpush3.bf16.msra.mxu0 %v411_v24  ;;  %444 = vmatprep.subr.bf16.mxu1 %v443_v38  ;;  %v457_v2 = vpack.c.bf16 %v190_v1, %v188_v0  ;;  %v195_v5 = vld [vmem:[#allocation7 + $0xf8] sm:$0xff]  ;;  %v192_v7 = vld [vmem:[#allocation7 + $0xe0] sm:$0xff]  ;;  %v194_v8 = vld [vmem:[#allocation7 + $0xf0] sm:$0xff] }
  0x48   :  { %416 = vmatprep.subr.bf16.mxu0 %v415_v34  ;;  %v459_v6 = vpack.c.bf16 %v195_v5, %v193_v4  ;;  %v461_v9 = vpack.c.bf16 %v194_v8, %v192_v7  ;;  %v345_v11 = vld [vmem:[%s686_s2] ss:$0 sm:$0xff]  ;;  %s586_s2 = smov [#allocation8]  }
  0x49   :  { %v196_v21 = vld [vmem:[%s688_s4] sm:$0x3]  ;;  %s332_s4 = sshll.u32 %s586_s2, 4  ;;  %s333_s4 = int_to_ptr.vmem [resolvable:$true] %s332_s4 }
  0x4a   :  { %446 = vmatpush1.bf16.msra.mxu1 %v445_v46  ;;  %v201_v23 = vrot.slane %v196_v21, %v200_v20  ;;  %v205_v24 = vrot.slane %v196_v21, %v204_v22  ;;  %s550_s9 = scalar_lea.vmem %s333_s4, 512  ;;  %p555_p11 = scmp.lt.s32.totalorder %s333_s4, %s333_s4 }
  0x4b   :  { %418 = vmatpush3.bf16.msra.mxu0 %v415_v34  ;;  %448 = vmatprep.subr.bf16.mxu1 %v447_v47  ;;  %p551_p10 = scmp.ne.s32.totalorder %s333_s4, %s550_s9  ;;  %p556_p12 = scmp.lt.s32.totalorder %s550_s9, %s550_s9 }
  0x4c   :  { %420 = vmatprep.subr.bf16.mxu0 %v419_v43 }
  0x4d   :  { %p557_p13 = por %p556_p12, %p555_p11 }
  0x4e   :  { %450 = vmatpush1.bf16.msra.mxu1 %v449_v55 }
  0x4f   :  { %422 = vmatpush3.bf16.msra.mxu0 %v419_v43  ;;  %452 = vmatprep.subr.bf16.mxu1 %v451_v56  ;;  %p558_p0 = pnand %p557_p13, %p551_p10 }
  0x50   :  { %424 = vmatprep.subr.bf16.mxu0 %v423_v52 }
  0x52   :  { %454 = vmatpush1.bf16.msra.mxu1 %v453_v62 }
  0x53   :  { %426 = vmatpush3.bf16.msra.mxu0 %v423_v52  ;;  %456 = vmatprep.subr.bf16.mxu1 %v455_v63 }
  0x54   :  { %428 = vmatprep.subr.bf16.mxu0 %v427_v61 }
  0x56   :  { %458 = vmatpush1.bf16.msra.mxu1 %v457_v2 }
  0x57   :  { %430 = vmatpush3.bf16.msra.mxu0 %v427_v61  ;;  %460 = vmatprep.subr.bf16.mxu1 %v459_v6 }
  0x5a   :  { %397 = vmatmul.mubr.f32.vlgmr.msra.gmra.mrb[0].mxu0 %v63_v3  ;;  %462 = vmatpush1.bf16.msra.mxu1 %v461_v9 }
 0x12d   :  { %v398_v12 = vpop.f32.mrb[0].mxu0 }
 0x12e   :  { %v153_v13 = vpop.f32.mrb[1].mxu0  ;;  %v159_v15 = vadd.f32 %v398_v12, %v345_v11 }
 0x12f   :  { %v154_v14 = vadd.f32 %v345_v11, %v153_v13 }
 0x130   :  { %v163_v17 = vmax.f32 %v159_v15, 0.0 }
 0x131   :  { %v162_v16 = vmax.f32 %v154_v14, 0.0 }
 0x133   :  { %273 = vmatmul.mubr.f32.vlgmr.msra.gmra.mrb[0].mxu1 %v162_v16 }
 0x134   :  { %278 = vmatprep.mubr.f32.mxu1 %v585_v10 }
 0x137   :  { %279 = vmatmul.mubr.f32.gmra.mrb[2].mxu1 %v163_v17 }
 0x206   :  { %v274_v25 = vpop.f32.mrb[0].mxu1 }
 0x207   :  { %v275_v26 = vadd.f32 %v274_v25, %v201_v23  ;;  %v276_v27 = vpop.f32.mrb[1].mxu1 }
 0x208   :  { %v277_v28 = vadd.f32 %v276_v27, %v205_v24 }
 0x209   :  { %472 = vtanh.f32 %v275_v26 }
 0x20a   :  { %v295_v29 = vand.u32 2147483647, %v277_v28  ;;  %v280_v30 = vpop.f32.mrb[2].mxu1  ;;  %v289_v53 = vmax.f32 %v277_v28, 0.0  ;;  %vm291_vm1 = vcmp.ne.f32.partialorder %v277_v28, %v277_v28 }
 0x20b   :  { %v281_v31 = vadd.f32 %v280_v30, %v201_v23  ;;  %v282_v32 = vpop.f32.mrb[3].mxu1 }
 0x20c   :  { %v297_v33 = vsub.f32 0.0, %v295_v29  ;;  %v283_v34 = vadd.f32 %v282_v32, %v205_v24 }
 0x20d   :  { %474 = vtanh.f32 %v281_v31 }
 0x20e   :  { %v299_v35 = vmul.f32 1.442695, %v297_v33  ;;  %v296_v36 = vand.u32 2147483647, %v283_v34  ;;  %v290_v61 = vmax.f32 %v283_v34, 0.0  ;;  %vm292_vm3 = vcmp.ne.f32.partialorder %v283_v34, %v283_v34 }
 0x210   :  { %476 = vpow2.f32 %v299_v35  ;;  %v298_v37 = vsub.f32 0.0, %v296_v36 }
 0x212   :  { %v301_v38 = vmul.f32 1.442695, %v298_v37 }
 0x213   :  { %v473_v39 = vpop.eup %472 }
 0x214   :  { %287 = vst [vmem:[#allocation8] sm:$0xff] %v473_v39  ;;  %478 = vpow2.f32 %v301_v38 }
 0x217   :  { %v475_v40 = vpop.eup %474 }
 0x218   :  { %288 = vst [vmem:[#allocation8 + $0x10] sm:$0xff] %v475_v40 }
 0x21a   :  { %v477_v41 = vpop.eup %476 }
 0x21b   :  { %v303_v42 = vadd.f32 1.0, %v477_v41  ;;  %v306_v45 = vmul.f32 -0.5, %v477_v41  ;;  %v309_v48 = vand.u32 2147483647, %v477_v41 }
 0x21d   :  { %480 = vlog2.f32 %v303_v42  ;;  %v307_v46 = vadd.f32 1.0, %v306_v45  ;;  %vm310_vm0 = vcmp.lt.f32.partialorder %v309_v48, 0.0004427343 }
 0x21e   :  { %v479_v43 = vpop.eup %478 }
 0x21f   :  { %v312_v44 = vadd.f32 1.0, %v479_v43  ;;  %v315_v47 = vmul.f32 -0.5, %v479_v43  ;;  %v308_v51 = vmul.f32 %v477_v41, %v307_v46  ;;  %v318_v54 = vand.u32 2147483647, %v479_v43 }
 0x221   :  { %482 = vlog2.f32 %v312_v44  ;;  %v316_v52 = vadd.f32 1.0, %v315_v47  ;;  %vm319_vm2 = vcmp.lt.f32.partialorder %v318_v54, 0.0004427343 }
 0x223   :  { %v317_v59 = vmul.f32 %v479_v43, %v316_v52 }
 0x227   :  { %v481_v49 = vpop.eup %480 }
 0x228   :  { %v305_v50 = vmul.f32 0.6931472, %v481_v49 }
 0x22a   :  { %v311_v55 = vsel %vm310_vm0, %v308_v51, %v305_v50 }
 0x22b   :  { %v483_v56 = vpop.eup %482  ;;  %v321_v57 = vadd.f32 %v311_v55, %v289_v53 }
 0x22c   :  { %v314_v58 = vmul.f32 0.6931472, %v483_v56 }
 0x22d   :  { %v323_v60 = vsel %vm291_vm1, %v277_v28, %v321_v57 }
 0x22e   :  { %325 = vst [vmem:[#allocation8 + $0x8] sm:$0xff] %v323_v60  ;;  %v320_v62 = vsel %vm319_vm2, %v317_v59, %v314_v58 }
 0x22f   :  { %v322_v63 = vadd.f32 %v320_v62, %v290_v61 }
 0x231   :  { %v324_v0 = vsel %vm292_vm3, %v283_v34, %v322_v63 }
 0x232   :  { %326 = vst [vmem:[#allocation8 + $0x18] sm:$0xff] %v324_v0 }
 0x233   :  { %561 = shalt.err (!%p558_p0)
}
 0x234   :  { %s562_s12 = scalar_lea.hbm %s689_s5, 512 }
 0x235   :  { %p563_p1 = scmp.ne.s32.totalorder %s689_s5, %s562_s12  ;;  %p566_p2 = scmp.lt.u32.totalorder %s562_s12, %s689_s5 }
 0x237   :  { %p568_p3 = pnand %p566_p2, %p563_p1 }
 0x239   :  { %571 = shalt.err (!%p568_p3)
}
 0x23a   :  { %338 = dma.vmem_to_hbm [thread:$0]  %s333_s4, 512, %s689_s5, [#allocation4], %s583_s0, %s583_s0, %s584_s21  }
 0x23b   :  { %576 = dma.done.wait [#allocation4], 512  }
 0x23c   :  { %577 = vsyncadd [#allocation4], 4294966784 }
 0x23d   :  { %342 = vsyncpa [#allocation3], 1 }
 0x23e   :  { %343 = vsyncpa [#allocation6], 1 }
 0x23f   :  { %344 = vsyncpa [#allocation4], 1 }

</bundles_post_ra>
